<compile_context>
chip_gen: v7x
topology: tpu7x:2x2x1
jax: 0.10.0
libtpu: 0.0.40
codegen_flags: <defaults>
</compile_context>

<pallas_src>
import functools

import jax
import jax.numpy as jnp
from jax.experimental import pallas as pl
from jax.experimental.pallas import tpu as pltpu


def _round_up(x: int, m: int) -> int:
    return ((x + m - 1) // m) * m


def mdn_kernel(x_ref, w_ref, b_ref, g_ref, out_ref, *, ok):
    """Fused MDN forward for one batch tile.

    x_ref:   (BT, D)    VMEM  input tile (f32 or bf16)
    w_ref:   (D, Np)    VMEM  fused [pi | mean | std] weights, zero-padded to Np
    b_ref:   (1, Np)    VMEM  fused biases (f32)
    g_ref:   (Np, Np)   VMEM  0/1 block-diagonal K-group membership matrix
    out_ref: (BT, Np)   VMEM  single lane-dense packed output slab
    """
    BT, Np = out_ref.shape

    # One fused MXU push for all three heads (lane-dense N = Np).
    y = jnp.dot(x_ref[...], w_ref[...],
                preferred_element_type=jnp.float32) + b_ref[...]

    lane = jax.lax.broadcasted_iota(jnp.int32, (BT, Np), 1)
    is_pi = lane < ok
    is_std = (lane >= 2 * ok) & (lane < 3 * ok)

    # --- softmax over the mixture groups (pi lanes only) ---------------------
    # Row-wise max over the pi region is a constant per (row, group), so the
    # result is exactly softmax; keeps everything lane-dense (no reshape).
    m = jnp.max(jnp.where(is_pi, y, -jnp.inf), axis=-1, keepdims=True)
    # One exp over the whole slab: pi lanes get exp(y - m), std lanes exp(y).
    ex = jnp.exp(y - jnp.where(is_pi, m, 0.0))
    e_pi = jnp.where(is_pi, ex, 0.0)
    # Per-K-group denominator via a small resident matmul (MXU is idle here).
    gsum = jnp.dot(e_pi, g_ref[...], preferred_element_type=jnp.float32)
    gs = jnp.where(is_pi, gsum, 1.0)
    inv = pl.reciprocal(gs, approx=True)       # EUP slot (free vs VALU)
    inv = inv * (2.0 - gs * inv)               # one Newton step -> ~f32 exact
    pi_vals = e_pi * inv

    # --- select per-lane: pi -> softmax, std -> exp, mean/pad -> identity ----
    out_ref[...] = jnp.where(is_pi, pi_vals, jnp.where(is_std, ex, y))


def _fuse_params(params, ok: int, np_: int):
    """Concatenate [pi | mean | std] unpadded, then pad ONCE to np_ lanes."""
    wpi, bpi, wmu, bmu, wstd, bstd = params
    w = jnp.concatenate([wpi, wmu, wstd], axis=1)                      # (D, 3*ok)
    b = jnp.concatenate([bpi.reshape(1, ok), bmu.reshape(1, ok),
                         bstd.reshape(1, ok)], axis=1)                 # (1, 3*ok)
    pad = np_ - 3 * ok
    w = jnp.pad(w, ((0, 0), (0, pad)))
    b = jnp.pad(b, ((0, 0), (0, pad)))
    return w, b


def _group_matrix(np_: int, ok: int, num_mixture: int):
    """(Np, Np) 0/1 matrix: G[i, j] = 1 iff i, j are pi lanes in the same
    K-mixture group.  e_pi @ G gives every pi lane its group's sum."""
    idx = jnp.arange(np_)
    in_pi = idx < ok
    same = (idx[:, None] // num_mixture) == (idx[None, :] // num_mixture)
    return jnp.where(same & in_pi[:, None] & in_pi[None, :], 1.0, 0.0
                     ).astype(jnp.float32)


def mdn_forward_packed(x, params, output_dim, num_mixture, *,
                       block_b=1024, compute_dtype=jnp.float32):
    """Runs the fused kernel; returns the packed (Bp, Np) slab
    (lanes [0:ok)=pi, [ok:2ok)=mean, [2ok:3ok)=exp(log_std), rest=pad).
    Downstream consumers can read this slab directly to avoid an extra HBM
    pass; use unpack_mdn_outputs for the torch-shaped (B, O, K) tensors."""
    B, D = x.shape
    ok = output_dim * num_mixture
    np_ = _round_up(3 * ok, 128)          # single padded slab width

    w_fused, b_fused = _fuse_params(params, ok, np_)
    g_mat = _group_matrix(np_, ok, num_mixture)

    # Optional bf16 MXU path (v6e/v7x): halves the x HBM read. Keep f32
    # elementwise/outputs and f32 accumulation either way.
    if compute_dtype != jnp.float32:
        x = x.astype(compute_dtype)
        w_fused = w_fused.astype(compute_dtype)

    # Batch tile: big for HBM roofline, multiple of 8 sublanes, capped at
    # ceil(B/2) so the parallel grid keeps >= 2 steps for v7x's 2 TCs.
    half = _round_up(-(-B // 2), 8)
    BT = max(8, min(_round_up(block_b, 8), half))
    Bp = _round_up(B, BT)
    x_p = jnp.pad(x, ((0, Bp - B), (0, 0))) if Bp != B else x
    grid = (Bp // BT,)

    kernel = functools.partial(mdn_kernel, ok=ok)

    cost = pl.CostEstimate(
        flops=2 * Bp * D * np_ + 2 * Bp * np_ * np_,
        transcendentals=2 * Bp * np_,
        bytes_accessed=4 * (Bp * D + D * np_ + np_ + np_ * np_ + Bp * np_),
    )

    out = pl.pallas_call(
        kernel,
        out_shape=jax.ShapeDtypeStruct((Bp, np_), jnp.float32),
        grid_spec=pltpu.PrefetchScalarGridSpec(
            num_scalar_prefetch=0,
            grid=grid,
            in_specs=[
                pl.BlockSpec((BT, D), lambda i: (i, 0)),        # x tile
                pl.BlockSpec((D, np_), lambda i: (0, 0)),       # fused W, resident
                pl.BlockSpec((1, np_), lambda i: (0, 0)),       # fused b, resident
                pl.BlockSpec((np_, np_), lambda i: (0, 0)),     # group matrix, resident
            ],
            out_specs=pl.BlockSpec((BT, np_), lambda i: (i, 0)),
        ),
        compiler_params=pltpu.CompilerParams(
            dimension_semantics=("parallel",),   # shards batch across TCs on v7x
            vmem_limit_bytes=32 * 1024 * 1024,   # lifts v5e default; safe on v7x
        ),
        cost_estimate=cost,
    )(x_p, w_fused, b_fused, g_mat)
    return out


def unpack_mdn_outputs(packed, B, output_dim, num_mixture):
    """Strip padding and apply the torch .view(B, O, K) (layout plumbing)."""
    ok = output_dim * num_mixture
    pi = packed[:B, 0 * ok:1 * ok].reshape(B, output_dim, num_mixture)
    mean = packed[:B, 1 * ok:2 * ok].reshape(B, output_dim, num_mixture)
    std = packed[:B, 2 * ok:3 * ok].reshape(B, output_dim, num_mixture)
    return pi, mean, std


def mdn_forward(x, params, output_dim, num_mixture, *, block_b=1024,
                compute_dtype=jnp.float32):
    packed = mdn_forward_packed(x, params, output_dim, num_mixture,
                                block_b=block_b, compute_dtype=compute_dtype)
    return unpack_mdn_outputs(packed, x.shape[0], output_dim, num_mixture)


def init_params(key, in_dim, output_dim, num_mixture):
    """Deterministic synthetic init, same shapes as the three nn.Linear heads.
    Weights are stored transposed: (in_dim, output_dim*num_mixture)."""
    ok = output_dim * num_mixture
    bound = 1.0 / jnp.sqrt(jnp.float32(in_dim))
    keys = jax.random.split(key, 6)
    wpi = jax.random.uniform(keys[0], (in_dim, ok), jnp.float32, -bound, bound)
    bpi = jax.random.uniform(keys[1], (1, ok), jnp.float32, -bound, bound)
    wmu = jax.random.uniform(keys[2], (in_dim, ok), jnp.float32, -bound, bound)
    bmu = jax.random.uniform(keys[3], (1, ok), jnp.float32, -bound, bound)
    wstd = jax.random.uniform(keys[4], (in_dim, ok), jnp.float32, -bound, bound)
    bstd = jax.random.uniform(keys[5], (1, ok), jnp.float32, -bound, bound)
    return (wpi, bpi, wmu, bmu, wstd, bstd)


def mdn_reference(x, params, output_dim, num_mixture):
    """Pure-JAX reference matching the PyTorch forward exactly."""
    B = x.shape[0]
    wpi, bpi, wmu, bmu, wstd, bstd = params
    pi_h = (x @ wpi + bpi).reshape(B, output_dim, num_mixture)
    pi = jax.nn.softmax(pi_h, axis=-1)
    mean = (x @ wmu + bmu).reshape(B, output_dim, num_mixture)
    std = jnp.exp(x @ wstd + bstd).reshape(B, output_dim, num_mixture)
    return pi, mean, std


if __name__ == "__main__":
    # input_shape=(32,), output_shape=(4,), num_mixture=8, batch=2
    B, D, O, K = 2, 32, 4, 8

    key = jax.random.PRNGKey(0)
    k_x, k_p = jax.random.split(key)
    x = jax.random.normal(k_x, (B, D), dtype=jnp.float32)
    params = init_params(k_p, D, O, K)

    pi, mean, std = mdn_forward(x, params, O, K)
    jax.block_until_ready((pi, mean, std))

    # correctness check against pure-JAX reference
    pi_r, mean_r, std_r = mdn_reference(x, params, O, K)
    assert pi.shape == (B, O, K) and mean.shape == (B, O, K) and std.shape == (B, O, K)
    assert jnp.allclose(pi, pi_r, atol=1e-5, rtol=1e-5)
    assert jnp.allclose(mean, mean_r, atol=1e-5, rtol=1e-5)
    assert jnp.allclose(std, std_r, atol=1e-5, rtol=1e-5)
    # pi rows sum to 1 over the mixture axis
    assert jnp.allclose(jnp.sum(pi, axis=-1), 1.0, atol=1e-5)

    print("KERNEL_OK")
</pallas_src>

<mosaic_0001>
module attributes {stable_mosaic.version = 11 : i64} {
  func.func @mdn_kernel(%arg0: i32, %arg1: memref<8x32xf32, #tpu.memory_space<vmem>>, %arg2: memref<32x128xf32, #tpu.memory_space<vmem>>, %arg3: memref<1x128xf32, #tpu.memory_space<vmem>>, %arg4: memref<128x128xf32, #tpu.memory_space<vmem>>, %arg5: memref<8x128xf32, #tpu.memory_space<vmem>>) attributes {dimension_semantics = [#tpu.dimension_semantics<parallel>], iteration_bounds = array<i64: 1>, scalar_prefetch = 0 : i64, scratch_operands = 0 : i64, tpu.core_type = #tpu.core_type<tc>, window_params = [{transform_indices = @transform_0, window_bounds = array<i64: 8, 32>}, {pipeline_mode = #tpu.pipeline_mode<synchronous>, transform_indices = @transform_1, window_bounds = array<i64: 32, 128>}, {pipeline_mode = #tpu.pipeline_mode<synchronous>, transform_indices = @transform_2, window_bounds = array<i64: 1, 128>}, {pipeline_mode = #tpu.pipeline_mode<synchronous>, transform_indices = @transform_3, window_bounds = array<i64: 128, 128>}, {transform_indices = @transform_4, window_bounds = array<i64: 8, 128>}]} {
    %c0 = arith.constant 0 : index
    %c0_0 = arith.constant 0 : index
    %0 = vector.load %arg1[%c0, %c0_0] : memref<8x32xf32, #tpu.memory_space<vmem>>, vector<8x32xf32>
    %c0_1 = arith.constant 0 : index
    %c0_2 = arith.constant 0 : index
    %1 = vector.load %arg2[%c0_1, %c0_2] : memref<32x128xf32, #tpu.memory_space<vmem>>, vector<32x128xf32>
    %cst = arith.constant dense<0.000000e+00> : vector<8x128xf32>
    %2 = tpu.matmul %0, %1, %cst {dimension_numbers = #tpu.dot_dimension_numbers<[1], [0], [0], [1], [0, 0, 1, 1], [], []>} : vector<8x32xf32>, vector<32x128xf32>, vector<8x128xf32> -> vector<8x128xf32>
    %c0_3 = arith.constant 0 : index
    %c0_4 = arith.constant 0 : index
    %3 = vector.load %arg3[%c0_3, %c0_4] : memref<1x128xf32, #tpu.memory_space<vmem>>, vector<1x128xf32>
    %4 = vector.broadcast %3 : vector<1x128xf32> to vector<8x128xf32>
    %5 = arith.addf %2, %4 : vector<8x128xf32>
    %6 = tpu.iota {dimensions = array<i32: 1>} : vector<8x128xi32>
    %c32_i32 = arith.constant 32 : i32
    %7 = vector.broadcast %c32_i32 : i32 to vector<8x128xi32>
    %8 = arith.cmpi slt, %6, %7 : vector<8x128xi32>
    %c64_i32 = arith.constant 64 : i32
    %9 = vector.broadcast %c64_i32 : i32 to vector<8x128xi32>
    %10 = arith.cmpi sge, %6, %9 : vector<8x128xi32>
    %c96_i32 = arith.constant 96 : i32
    %11 = vector.broadcast %c96_i32 : i32 to vector<8x128xi32>
    %12 = arith.cmpi slt, %6, %11 : vector<8x128xi32>
    %13 = arith.andi %10, %12 : vector<8x128xi1>
    %cst_5 = arith.constant 0xFF800000 : f32
    %14 = vector.broadcast %cst_5 : f32 to vector<8x128xf32>
    %15 = arith.select %8, %5, %14 : vector<8x128xi1>, vector<8x128xf32>
    %cst_6 = arith.constant dense<0xFF800000> : vector<8xf32>
    %16 = vector.multi_reduction <maximumf>, %15, %cst_6 [1] : vector<8x128xf32> to vector<8xf32>
    %17 = vector.shape_cast %16 : vector<8xf32> to vector<8x1xf32>
    %cst_7 = arith.constant 0.000000e+00 : f32
    %18 = vector.shape_cast %17 : vector<8x1xf32> to vector<8x1xf32>
    %19 = vector.broadcast %18 : vector<8x1xf32> to vector<8x128xf32>
    %20 = vector.broadcast %cst_7 : f32 to vector<8x128xf32>
    %21 = arith.select %8, %19, %20 : vector<8x128xi1>, vector<8x128xf32>
    %22 = arith.subf %5, %21 : vector<8x128xf32>
    %23 = math.exp %22 : vector<8x128xf32>
    %cst_8 = arith.constant 0.000000e+00 : f32
    %24 = vector.broadcast %cst_8 : f32 to vector<8x128xf32>
    %25 = arith.select %8, %23, %24 : vector<8x128xi1>, vector<8x128xf32>
    %c0_9 = arith.constant 0 : index
    %c0_10 = arith.constant 0 : index
    %26 = vector.load %arg4[%c0_9, %c0_10] : memref<128x128xf32, #tpu.memory_space<vmem>>, vector<128x128xf32>
    %cst_11 = arith.constant dense<0.000000e+00> : vector<8x128xf32>
    %27 = tpu.matmul %25, %26, %cst_11 {dimension_numbers = #tpu.dot_dimension_numbers<[1], [0], [0], [1], [0, 0, 1, 1], [], []>} : vector<8x128xf32>, vector<128x128xf32>, vector<8x128xf32> -> vector<8x128xf32>
    %cst_12 = arith.constant 1.000000e+00 : f32
    %28 = vector.broadcast %cst_12 : f32 to vector<8x128xf32>
    %29 = arith.select %8, %27, %28 : vector<8x128xi1>, vector<8x128xf32>
    %30 = tpu.reciprocal %29 {approx = true} : vector<8x128xf32> -> vector<8x128xf32>
    %31 = arith.mulf %29, %30 : vector<8x128xf32>
    %cst_13 = arith.constant 2.000000e+00 : f32
    %32 = vector.broadcast %cst_13 : f32 to vector<8x128xf32>
    %33 = arith.subf %32, %31 : vector<8x128xf32>
    %34 = arith.mulf %30, %33 : vector<8x128xf32>
    %35 = arith.mulf %25, %34 : vector<8x128xf32>
    %36 = arith.select %13, %23, %5 : vector<8x128xi1>, vector<8x128xf32>
    %37 = arith.select %8, %35, %36 : vector<8x128xi1>, vector<8x128xf32>
    %c0_14 = arith.constant 0 : index
    %c0_15 = arith.constant 0 : index
    %38 = vector.load %arg5[%c0_14, %c0_15] : memref<8x128xf32, #tpu.memory_space<vmem>>, vector<8x128xf32>
    tpu.vector_store %arg5[%c0_14, %c0_15], %37 {strides = array<i32>} : memref<8x128xf32, #tpu.memory_space<vmem>>, vector<8x128xf32>,
    return
  }
  func.func @transform_0(%arg0: i32) -> (i32, i32) {
    %c0_i32 = arith.constant 0 : i32
    %c0_i32_0 = arith.constant 0 : i32
    return %arg0, %c0_i32 : i32, i32
  }
  func.func @transform_1(%arg0: i32) -> (i32, i32) {
    %c0_i32 = arith.constant 0 : i32
    %c0_i32_0 = arith.constant 0 : i32
    %c0_i32_1 = arith.constant 0 : i32
    return %c0_i32, %c0_i32_0 : i32, i32
  }
  func.func @transform_2(%arg0: i32) -> (i32, i32) {
    %c0_i32 = arith.constant 0 : i32
    %c0_i32_0 = arith.constant 0 : i32
    %c0_i32_1 = arith.constant 0 : i32
    return %c0_i32, %c0_i32_0 : i32, i32
  }
  func.func @transform_3(%arg0: i32) -> (i32, i32) {
    %c0_i32 = arith.constant 0 : i32
    %c0_i32_0 = arith.constant 0 : i32
    %c0_i32_1 = arith.constant 0 : i32
    return %c0_i32, %c0_i32_0 : i32, i32
  }
  func.func @transform_4(%arg0: i32) -> (i32, i32) {
    %c0_i32 = arith.constant 0 : i32
    %c0_i32_0 = arith.constant 0 : i32
    return %arg0, %c0_i32 : i32, i32
  }
}

</mosaic_0001>

<bundles_post_ra>
// kernel: tpu_custom_call.1
= control target key start
LH: loop header
LB: loop body
LE: loop exit
PB: predicated region body
PF: predicated region fallthrough
CT: control target
= control target key end

     0   :  { %9 = vsyncpa [#allocation3], 0  ;;  %s583_s0 = inlined_call_operand.hbm [shape: f32[8,32], index: 0, kind: input, shape index: {}]   ;;  %s584_s1 = inlined_call_operand.hbm [shape: f32[32,128], index: 1, kind: input, shape index: {}]   ;;  %s585_s2 = inlined_call_operand.vmem [shape: f32[1,128], index: 2, kind: input, shape index: {}]   ;;  %s586_s3 = inlined_call_operand.hbm [shape: f32[128,128], index: 3, kind: input, shape index: {}]   ;;  %s587_s4 = inlined_call_operand.hbm [shape: f32[8,128], index: 4, kind: output, shape index: {}]  }
   0x1   :  { %10 = vsyncpa [#allocation6], 0 }
   0x2   :  { %11 = vsyncpa [#allocation4], 0  ;;  %s476_s15 = smov [#allocation5]   ;;  %s382_s19 = scalar_lea.hbm %s584_s1, 512 }
   0x3   :  { %s27_s16 = sshll.u32 %s476_s15, 4  ;;  %p383_p0 = scmp.ne.s32.totalorder %s584_s1, %s382_s19  ;;  %s28_s16 = int_to_ptr.vmem [resolvable:$true] %s27_s16 }
   0x4   :  { %p386_p1 = scmp.lt.u32.totalorder %s382_s19, %s584_s1 }
   0x6   :  { %p388_p2 = pnand %p386_p1, %p383_p0 }
   0x8   :  { %391 = shalt.err (!%p388_p2)
}
   0x9   :  { %s392_s24 = scalar_lea.vmem %s28_s16, 512  ;;  %p397_p4 = scmp.lt.s32.totalorder %s28_s16, %s28_s16 }
   0xa   :  { %p393_p3 = scmp.ne.s32.totalorder %s28_s16, %s392_s24  ;;  %p398_p5 = scmp.lt.s32.totalorder %s392_s24, %s392_s24 }
   0xc   :  { %p399_p6 = por %p398_p5, %p397_p4 }
   0xe   :  { %p400_p7 = pnand %p399_p6, %p393_p3 }
  0x10   :  { %403 = shalt.err (!%p400_p7)
}
  0x11   :  { %s477_s25 = smov 128   ;;  %s478_s26 = smov 8  }
  0x12   :  { %33 = dma.hbm_to_vmem [thread:$0]  %s584_s1, 512, %s28_s16, [#allocation6], %s477_s25, %s477_s25, %s478_s26  }
  0x13   :  { %s479_s29 = smov [#allocation2]   ;;  %s480_s5 = smov [#allocation7]  }
  0x14   :  { %s18_s30 = sshll.u32 %s479_s29, 4  ;;  %s41_s6 = sshll.u32 %s480_s5, 4  ;;  %s19_s30 = int_to_ptr.vmem [resolvable:$true] %s18_s30  ;;  %s42_s6 = int_to_ptr.vmem [resolvable:$true] %s41_s6 }
  0x15   :  { %s404_s9 = scalar_lea.hbm %s583_s0, 128 }
  0x16   :  { %p405_p8 = scmp.ne.s32.totalorder %s583_s0, %s404_s9  ;;  %p408_p9 = scmp.lt.u32.totalorder %s404_s9, %s583_s0 }
  0x18   :  { %p410_p10 = pnand %p408_p9, %p405_p8 }
  0x1a   :  { %413 = shalt.err (!%p410_p10)
}
  0x1b   :  { %s414_s1 = scalar_lea.vmem %s19_s30, 128  ;;  %p419_p12 = scmp.lt.s32.totalorder %s19_s30, %s19_s30 }
  0x1c   :  { %p415_p11 = scmp.ne.s32.totalorder %s19_s30, %s414_s1  ;;  %p420_p13 = scmp.lt.s32.totalorder %s414_s1, %s414_s1 }
  0x1e   :  { %p421_p0 = por %p420_p13, %p419_p12 }
  0x20   :  { %p422_p1 = pnand %p421_p0, %p415_p11 }
  0x22   :  { %425 = shalt.err (!%p422_p1)
}
  0x23   :  { %21 = dma.hbm_to_vmem [thread:$0]  %s583_s0, 128, %s19_s30, [#allocation3]  }
  0x24   :  { %s426_s18 = scalar_lea.hbm %s586_s3, 2048 }
  0x25   :  { %p427_p2 = scmp.ne.s32.totalorder %s586_s3, %s426_s18  ;;  %p430_p3 = scmp.lt.u32.totalorder %s426_s18, %s586_s3 }
  0x27   :  { %p432_p4 = pnand %p430_p3, %p427_p2 }
  0x29   :  { %435 = shalt.err (!%p432_p4)
}
  0x2a   :  { %s436_s23 = scalar_lea.vmem %s42_s6, 2048  ;;  %p441_p6 = scmp.lt.s32.totalorder %s42_s6, %s42_s6 }
  0x2b   :  { %p437_p5 = scmp.ne.s32.totalorder %s42_s6, %s436_s23  ;;  %p442_p7 = scmp.lt.s32.totalorder %s436_s23, %s436_s23 }
  0x2d   :  { %p443_p8 = por %p442_p7, %p441_p6 }
  0x2f   :  { %p444_p9 = pnand %p443_p8, %p437_p5 }
  0x31   :  { %447 = shalt.err (!%p444_p9)
}
  0x32   :  { %47 = dma.hbm_to_vmem [thread:$0]  %s586_s3, 2048, %s42_s6, [#allocation6], %s477_s25, %s477_s25, %s478_s26  }
  0x33   :  { %470 = dma.done.wait [#allocation3], 128  }
  0x34   :  { %471 = vsyncadd [#allocation3], 4294967168 }
  0x35   :  { %472 = dma.done.wait [#allocation6], 2560  }
  0x36   :  { %473 = vsyncadd [#allocation6], 4294964736  ;;  %v481_v0 = vmov 0.0|0.0   ;;  %vm482_vm0 = vmmov 0   ;;  %v483_v1 = vmov 0.0   ;;  %v58_v2 = vld [vmem:[#allocation5] sm:$0xff]  ;;  %v143_v21 = vlaneseq }
  0x37   :  { %339 = vmatprep.subr.bf16.mxu0 %v481_v0  ;;  %301 = vmatprep.mubr.msk.f32.mxu0 %vm482_vm0, %v483_v1  ;;  %v59_v3 = vld [vmem:[#allocation5 + $0x8] sm:$0xff]  ;;  %v60_v4 = vld [vmem:[#allocation5 + $0x10] sm:$0xff]  ;;  %v61_v6 = vld [vmem:[#allocation5 + $0x18] sm:$0xff]  ;;  %vm69_vm1 = vcmask 261120  }
  0x38   :  { %345 = vmatprep.subr.bf16.mxu1 %v481_v0  ;;  %336 = vmatprep.mubr.msk.f32.mxu1 %vm482_vm0, %v483_v1  ;;  %v340_v5 = vpack.c.bf16 %v59_v3, %v58_v2  ;;  %v343_v7 = vpack.c.bf16 %v61_v6, %v60_v4  ;;  %v57_v8 = vld [vmem:[#allocation2] sm:$0xff]  ;;  %v157_v9 = vld [vmem:[#allocation7] sm:$0xff]  ;;  %v158_v10 = vld [vmem:[#allocation7 + $0x8] sm:$0xff]  ;;  %v144_v22 = vand.u32 127, %v143_v21 }
  0x39   :  { %v159_v11 = vld [vmem:[#allocation7 + $0x10] sm:$0xff]  ;;  %v346_v12 = vpack.c.bf16 %v158_v10, %v157_v9  ;;  %v160_v13 = vld [vmem:[#allocation7 + $0x18] sm:$0xff]  ;;  %v161_v15 = vld [vmem:[#allocation7 + $0x20] sm:$0xff] }
  0x3a   :  { %341 = vmatpush3.bf16.msra.mxu0 %v340_v5  ;;  %v349_v14 = vpack.c.bf16 %v160_v13, %v159_v11  ;;  %v162_v16 = vld [vmem:[#allocation7 + $0x28] sm:$0xff]  ;;  %v163_v18 = vld [vmem:[#allocation7 + $0x30] sm:$0xff]  ;;  %v164_v19 = vld [vmem:[#allocation7 + $0x38] sm:$0xff]  ;;  %vm145_vm2 = vcmp.lt.s32.totalorder %v144_v22, 32  ;;  %vm146_vm3 = vcmp.ge.s32.totalorder %v144_v22, 64  ;;  %vm147_vm4 = vcmp.lt.s32.totalorder %v144_v22, 96 }
  0x3b   :  { %342 = vmatprep.subr.bf16.mxu0 %v481_v0  ;;  %347 = vmatpush3.bf16.msra.mxu1 %v346_v12  ;;  %v352_v17 = vpack.c.bf16 %v162_v16, %v161_v15  ;;  %v355_v20 = vpack.c.bf16 %v164_v19, %v163_v18  ;;  %v268_v23 = vld [vmem:[%s585_s2] ss:$0 sm:$0xff]  ;;  %v165_v28 = vld [vmem:[#allocation7 + $0x40] sm:$0xff]  ;;  %v166_v29 = vld [vmem:[#allocation7 + $0x48] sm:$0xff]  ;;  %s484_s2 = smov [#allocation8]  }
  0x3c   :  { %348 = vmatprep.subr.bf16.mxu1 %v481_v0  ;;  %v358_v30 = vpack.c.bf16 %v166_v29, %v165_v28  ;;  %v167_v31 = vld [vmem:[#allocation7 + $0x50] sm:$0xff]  ;;  %v168_v32 = vld [vmem:[#allocation7 + $0x58] sm:$0xff]  ;;  %v169_v34 = vld [vmem:[#allocation7 + $0x60] sm:$0xff]  ;;  %s258_s26 = sshll.u32 %s484_s2, 4  ;;  %s259_s26 = int_to_ptr.vmem [resolvable:$true] %s258_s26 }
  0x3d   :  { %v361_v33 = vpack.c.bf16 %v168_v32, %v167_v31  ;;  %v170_v35 = vld [vmem:[#allocation7 + $0x68] sm:$0xff]  ;;  %v171_v37 = vld [vmem:[#allocation7 + $0x70] sm:$0xff]  ;;  %v172_v38 = vld [vmem:[#allocation7 + $0x78] sm:$0xff]  ;;  %s448_s27 = scalar_lea.vmem %s259_s26, 128  ;;  %p453_p11 = scmp.lt.s32.totalorder %s259_s26, %s259_s26 }
  0x3e   :  { %344 = vmatpush3.bf16.msra.mxu0 %v343_v7  ;;  %v364_v36 = vpack.c.bf16 %v170_v35, %v169_v34  ;;  %v367_v39 = vpack.c.bf16 %v172_v38, %v171_v37  ;;  %vm148_vm5 = vmand %vm146_vm3, %vm147_vm4  ;;  %p449_p10 = scmp.ne.s32.totalorder %s259_s26, %s448_s27  ;;  %p454_p12 = scmp.lt.s32.totalorder %s448_s27, %s448_s27 }
  0x3f   :  { %350 = vmatpush3.bf16.msra.mxu1 %v349_v14 }
  0x40   :  { %351 = vmatprep.subr.bf16.mxu1 %v481_v0  ;;  %p455_p13 = por %p454_p12, %p453_p11 }
  0x41   :  { %302 = vmatmul.mubr.msk.f32.vlgmr.msra.gmra.mrb[0].mxu0 %vm69_vm1, %v57_v8 }
  0x42   :  { %p456_p0 = pnand %p455_p13, %p449_p10 }
  0x43   :  { %353 = vmatpush3.bf16.msra.mxu1 %v352_v17 }
  0x44   :  { %354 = vmatprep.subr.bf16.mxu1 %v481_v0 }
  0x47   :  { %356 = vmatpush3.bf16.msra.mxu1 %v355_v20 }
  0x48   :  { %357 = vmatprep.subr.bf16.mxu1 %v481_v0 }
  0x4b   :  { %359 = vmatpush3.bf16.msra.mxu1 %v358_v30 }
  0x4c   :  { %360 = vmatprep.subr.bf16.mxu1 %v481_v0 }
  0x4f   :  { %362 = vmatpush3.bf16.msra.mxu1 %v361_v33 }
  0x50   :  { %363 = vmatprep.subr.bf16.mxu1 %v481_v0 }
  0x53   :  { %365 = vmatpush3.bf16.msra.mxu1 %v364_v36 }
  0x54   :  { %366 = vmatprep.subr.bf16.mxu1 %v481_v0 }
  0x57   :  { %368 = vmatpush3.bf16.msra.mxu1 %v367_v39 }
 0x114   :  { %v139_v24 = vpop.f32.mrb[0].mxu0 }
 0x115   :  { %v140_v25 = vadd.f32 %v268_v23, %v139_v24  ;;  %v303_v26 = vpop.f32.mrb[1].mxu0 }
 0x117   :  { %v149_v27 = vsel %vm145_vm2, %v140_v25, -inf }
 0x118   :  { %150 = vmax.xlane.f32.xlu0 %v149_v27 }
 0x1a5   :  { %v151_v40 = vpop.xlane.xlu0 %150 }
 0x1a6   :  { %v152_v41 = vsel %vm145_vm2, %v151_v40, 0.0 }
 0x1a7   :  { %v153_v42 = vsub.f32 %v140_v25, %v152_v41 }
 0x1a9   :  { %v154_v43 = vmul.f32 1.442695, %v153_v42 }
 0x1ab   :  { %378 = vpow2.f32 %v154_v43 }
 0x1b5   :  { %v379_v44 = vpop.eup %378 }
 0x1b6   :  { %337 = vmatmul.mubr.msk.f32.vlgmr.msra.gmra.mrb[0].mxu1 %vm145_vm2, %v379_v44  ;;  %v156_v52 = vsel %vm145_vm2, %v379_v44, 0.0  ;;  %v249_v54 = vsel %vm148_vm5, %v379_v44, %v140_v25 }
 0x289   :  { %v239_v45 = vpop.f32.mrb[0].mxu1 }
 0x28a   :  { %v243_v46 = vsel %vm145_vm2, %v239_v45, 1.0  ;;  %v338_v47 = vpop.f32.mrb[1].mxu1 }
 0x28b   :  { %380 = vrcp.f32 %v243_v46 }
 0x295   :  { %v381_v48 = vpop.eup %380 }
 0x296   :  { %v245_v49 = vmul.f32 %v381_v48, %v243_v46 }
 0x298   :  { %v246_v50 = vsub.f32 2.0, %v245_v49 }
 0x29a   :  { %v247_v51 = vmul.f32 %v381_v48, %v246_v50 }
 0x29c   :  { %v248_v53 = vmul.f32 %v247_v51, %v156_v52 }
 0x29e   :  { %v250_v55 = vsel %vm145_vm2, %v248_v53, %v249_v54 }
 0x29f   :  { %251 = vst [vmem:[#allocation8] sm:$0xff] %v250_v55 }
 0x2a0   :  { %459 = shalt.err (!%p456_p0)
}
 0x2a1   :  { %s460_s30 = scalar_lea.hbm %s587_s4, 128 }
 0x2a2   :  { %p461_p1 = scmp.ne.s32.totalorder %s587_s4, %s460_s30  ;;  %p464_p2 = scmp.lt.u32.totalorder %s460_s30, %s587_s4 }
 0x2a4   :  { %p466_p3 = pnand %p464_p2, %p461_p1 }
 0x2a6   :  { %469 = shalt.err (!%p466_p3)
}
 0x2a7   :  { %261 = dma.vmem_to_hbm [thread:$0]  %s259_s26, 128, %s587_s4, [#allocation4]  }
 0x2a8   :  { %474 = dma.done.wait [#allocation4], 128  }
 0x2a9   :  { %475 = vsyncadd [#allocation4], 4294967168 }
 0x2aa   :  { %265 = vsyncpa [#allocation3], 1 }
 0x2ab   :  { %266 = vsyncpa [#allocation6], 1 }
 0x2ac   :  { %267 = vsyncpa [#allocation4], 1 }

</bundles_post_ra>
